<compile_context>
chip_gen: v5e
topology: v5e:2x2
jax: 0.10.0
libtpu: 0.0.40
codegen_flags: <defaults>
</compile_context>

<pallas_src>
import functools
import math

import jax
import jax.numpy as jnp
from jax.experimental import pallas as pl
from jax.experimental.pallas import tpu as pltpu

_LANES = 128
_SUBLANES = 8
_MAX_BLOCK_ROWS = 4096   # (4096, 128) f32 == 2 MiB per input block per step
_NUM_CHUNKS = 2          # leading "parallel" axis (2 TCs on v7x; no-op on 1-TC chips)


# ---------------------------------------------------------------------------
# Pallas kernels
# ---------------------------------------------------------------------------
def _tail_mask(g_block, block_rows, full_rows, rem):
    """(block_rows, 128) mask selecting only valid (unpadded / in-bounds) elems."""
    row = jax.lax.broadcasted_iota(jnp.int32, (block_rows, _LANES), 0)
    row = row + g_block * block_rows
    if rem == 0:
        return row < full_rows
    col = jax.lax.broadcasted_iota(jnp.int32, (block_rows, _LANES), 1)
    return (row < full_rows) | ((row == full_rows) & (col < rem))


def _sq_diff_kernel(x_ref, y_ref, o_ref, *, block_rows, steps, full_rows, rem):
    """Per-chunk partial sum of (x - y)^2 into a resident (8, 128) output block."""
    c = pl.program_id(0)
    s = pl.program_id(1)

    @pl.when(s == 0)
    def _():
        o_ref[...] = jnp.zeros_like(o_ref)

    g = c * steps + s  # intended global block index (may exceed last block -> fully masked)
    d = x_ref[...].astype(jnp.float32) - y_ref[...].astype(jnp.float32)
    val = jnp.where(_tail_mask(g, block_rows, full_rows, rem), d * d, 0.0)
    # (block_rows, 128) -> (block_rows//8, 8, 128) is tile-aligned; the leading-axis
    # sum is a chain of vector adds (VALU) into the resident (8, 128) accumulator.
    o_ref[...] += val.reshape(-1, _SUBLANES, _LANES).sum(axis=0)


def _sum_log_kernel(x_ref, o_ref, *, block_rows, steps, full_rows, rem):
    """Per-chunk partial sum of log(x) into a resident (8, 128) output block."""
    c = pl.program_id(0)
    s = pl.program_id(1)

    @pl.when(s == 0)
    def _():
        o_ref[...] = jnp.zeros_like(o_ref)

    g = c * steps + s
    lg = jnp.log(x_ref[...].astype(jnp.float32))
    val = jnp.where(_tail_mask(g, block_rows, full_rows, rem), lg, 0.0)
    o_ref[...] += val.reshape(-1, _SUBLANES, _LANES).sum(axis=0)


# ---------------------------------------------------------------------------
# Wrappers
# ---------------------------------------------------------------------------
def _cdiv(a, b):
    return -(-a // b)


def _prep(x, pad_value):
    """Flatten to (rows, 128) in native dtype; tail-pad only when needed."""
    flat = x.reshape(-1)
    n = int(flat.shape[0])
    rows = max(_cdiv(n, _LANES), _SUBLANES)
    padded = rows * _LANES
    if padded != n:  # < 1024 extra elements; skipped entirely for aligned sizes
        flat = jnp.pad(flat, (0, padded - n), constant_values=pad_value)
    return flat.reshape(rows, _LANES), n


def _grid_params(rows):
    block_rows = min(_MAX_BLOCK_ROWS, (rows // _SUBLANES) * _SUBLANES)
    total_blocks = _cdiv(rows, block_rows)
    num_chunks = min(_NUM_CHUNKS, total_blocks)
    steps = _cdiv(total_blocks, num_chunks)
    return block_rows, total_blocks, num_chunks, steps


def _reduce_call(kernel_fn, inputs, n):
    rows = inputs[0].shape[0]
    block_rows, total_blocks, num_chunks, steps = _grid_params(rows)
    kernel = functools.partial(
        kernel_fn, block_rows=block_rows, steps=steps,
        full_rows=n // _LANES, rem=n % _LANES)

    # Clamp overflow steps of the last chunk onto the last real block; the in-kernel
    # mask (based on the *unclamped* global block index) zeroes their contribution.
    in_map = lambda c, s: (jnp.minimum(c * steps + s, total_blocks - 1), 0)

    partial = pl.pallas_call(
        kernel,
        out_shape=jax.ShapeDtypeStruct((num_chunks * _SUBLANES, _LANES), jnp.float32),
        grid_spec=pltpu.PrefetchScalarGridSpec(
            num_scalar_prefetch=0,
            grid=(num_chunks, steps),
            in_specs=[pl.BlockSpec((block_rows, _LANES), in_map)
                      for _ in range(len(inputs))],
            out_specs=pl.BlockSpec((_SUBLANES, _LANES), lambda c, s: (c, 0)),
        ),
        compiler_params=pltpu.CompilerParams(
            dimension_semantics=("parallel", "arbitrary")),
    )(*inputs)
    # Tiny lane-dense partial-sum buffer -> scalar (cheap JAX glue).
    return jnp.sum(partial)


def _sum_sq_diff(x, y):
    xp, n = _prep(x, 0.0)
    yp, _ = _prep(y, 0.0)
    return _reduce_call(_sq_diff_kernel, (xp, yp), n)


def _sum_log(x):
    xp, n = _prep(x, 1.0)  # pad value is masked anyway; 1.0 keeps log finite
    return _reduce_call(_sum_log_kernel, (xp,), n)


class RateDistortionLoss:
    """Custom rate distortion loss with a Lagrangian parameter (Pallas/TPU)."""

    def __init__(self, lmbda=0.01):
        self.lmbda = lmbda

    def __call__(self, output, target):
        if len(output) == 3:
            x_hat, y_likelihoods, z_likelihoods = output
            likelihoods = [y_likelihoods, z_likelihoods]
        else:
            x_hat, likelihoods = output
            if not isinstance(likelihoods, (list, tuple)):
                likelihoods = [likelihoods]

        N, _, H, W = target.shape
        num_pixels = N * H * W

        # bpp: sum over likelihood tensors of sum(log(l)) / (-ln(2) * num_pixels)
        # TODO(synk): could fuse the per-likelihood pallas_calls into a single
        # multi-input launch to shave a few microseconds of launch overhead.
        bpp_loss = jnp.float32(0.0)
        for likelihood in likelihoods:
            bpp_loss = bpp_loss + _sum_log(likelihood) / (
                -math.log(2) * num_pixels
            )

        # MSE (mean over all elements, matching torch.nn.MSELoss default)
        total_elems = 1
        for d in target.shape:
            total_elems *= d
        mse_loss = _sum_sq_diff(x_hat, target) / jnp.float32(total_elems)

        rate_distortion = self.lmbda * (255.0 ** 2) * mse_loss + bpp_loss
        return rate_distortion, mse_loss, bpp_loss


# ---------------------------------------------------------------------------
# Demo / correctness check
# ---------------------------------------------------------------------------
if __name__ == "__main__":
    key = jax.random.PRNGKey(0)
    k1, k2, k3, k4 = jax.random.split(key, 4)

    # Small image-like shapes (NCHW).
    N, C, H, W = 2, 3, 16, 16
    target = jax.random.uniform(k1, (N, C, H, W), dtype=jnp.float32)
    x_hat = target + 0.05 * jax.random.normal(k2, (N, C, H, W), dtype=jnp.float32)

    # Likelihoods in (0, 1].
    y_likelihoods = jax.random.uniform(
        k3, (N, 8, 8, 8), dtype=jnp.float32, minval=0.05, maxval=1.0
    )
    z_likelihoods = jax.random.uniform(
        k4, (N, 8, 4, 4), dtype=jnp.float32, minval=0.05, maxval=1.0
    )

    loss_fn = RateDistortionLoss(lmbda=0.01)
    rd, mse, bpp = loss_fn((x_hat, y_likelihoods, z_likelihoods), target)
    jax.block_until_ready((rd, mse, bpp))

    # Reference check in plain JAX.
    num_pixels = N * H * W
    bpp_ref = (
        jnp.sum(jnp.log(y_likelihoods)) + jnp.sum(jnp.log(z_likelihoods))
    ) / (-math.log(2) * num_pixels)
    mse_ref = jnp.mean((x_hat - target) ** 2)
    rd_ref = 0.01 * 255.0 ** 2 * mse_ref + bpp_ref

    assert jnp.allclose(mse, mse_ref, rtol=1e-5, atol=1e-6), (mse, mse_ref)
    assert jnp.allclose(bpp, bpp_ref, rtol=1e-5, atol=1e-5), (bpp, bpp_ref)
    assert jnp.allclose(rd, rd_ref, rtol=1e-5, atol=1e-5), (rd, rd_ref)

    print("KERNEL_OK")
</pallas_src>

<mosaic_0001>
module attributes {stable_mosaic.version = 11 : i64} {
  func.func @_sum_log_kernel(%arg0: i32, %arg1: i32, %arg2: memref<8x128xf32, #tpu.memory_space<vmem>>, %arg3: memref<8x128xf32, #tpu.memory_space<vmem>>) attributes {dimension_semantics = [#tpu.dimension_semantics<parallel>, #tpu.dimension_semantics<arbitrary>], iteration_bounds = array<i64: 1, 1>, scalar_prefetch = 0 : i64, scratch_operands = 0 : i64, tpu.core_type = #tpu.core_type<tc>, window_params = [{transform_indices = @transform_0, window_bounds = array<i64: 8, 128>}, {transform_indices = @transform_1, window_bounds = array<i64: 8, 128>}]} {
    %c0_i32 = arith.constant 0 : i32
    %0 = arith.cmpi eq, %arg1, %c0_i32 : i32
    %1 = arith.extui %0 : i1 to i32
    %c0_i32_0 = arith.constant 0 : i32
    %2 = arith.cmpi ne, %1, %c0_i32_0 : i32
    scf.if %2 {
      %cst_8 = arith.constant 0.000000e+00 : f32
      %20 = vector.broadcast %cst_8 : f32 to vector<8x128xf32>
      %c0_9 = arith.constant 0 : index
      %c0_10 = arith.constant 0 : index
      %21 = vector.load %arg3[%c0_9, %c0_10] : memref<8x128xf32, #tpu.memory_space<vmem>>, vector<8x128xf32>
      tpu.vector_store %arg3[%c0_9, %c0_10], %20 {strides = array<i32>} : memref<8x128xf32, #tpu.memory_space<vmem>>, vector<8x128xf32>,
    } else {
    }
    %c1_i32 = arith.constant 1 : i32
    %3 = arith.muli %arg0, %c1_i32 : i32
    %4 = arith.addi %3, %arg1 : i32
    %c0 = arith.constant 0 : index
    %c0_1 = arith.constant 0 : index
    %5 = vector.load %arg2[%c0, %c0_1] : memref<8x128xf32, #tpu.memory_space<vmem>>, vector<8x128xf32>
    %6 = math.log %5 : vector<8x128xf32>
    %7 = tpu.iota {dimensions = array<i32: 0>} : vector<8x128xi32>
    %c8_i32 = arith.constant 8 : i32
    %8 = arith.muli %4, %c8_i32 : i32
    %9 = vector.broadcast %8 : i32 to vector<8x128xi32>
    %10 = arith.addi %7, %9 : vector<8x128xi32>
    %c8_i32_2 = arith.constant 8 : i32
    %11 = vector.broadcast %c8_i32_2 : i32 to vector<8x128xi32>
    %12 = arith.cmpi slt, %10, %11 : vector<8x128xi32>
    %cst = arith.constant 0.000000e+00 : f32
    %13 = vector.broadcast %cst : f32 to vector<8x128xf32>
    %14 = arith.select %12, %6, %13 : vector<8x128xi1>, vector<8x128xf32>
    %c0_3 = arith.constant 0 : index
    %c0_4 = arith.constant 0 : index
    %15 = vector.load %arg3[%c0_3, %c0_4] : memref<8x128xf32, #tpu.memory_space<vmem>>, vector<8x128xf32>
    %16 = vector.shape_cast %14 : vector<8x128xf32> to vector<1x8x128xf32>
    %cst_5 = arith.constant dense<0.000000e+00> : vector<8x128xf32>
    %17 = vector.multi_reduction <add>, %16, %cst_5 [0] : vector<1x8x128xf32> to vector<8x128xf32>
    %18 = arith.addf %15, %17 : vector<8x128xf32>
    %c0_6 = arith.constant 0 : index
    %c0_7 = arith.constant 0 : index
    %19 = vector.load %arg3[%c0_6, %c0_7] : memref<8x128xf32, #tpu.memory_space<vmem>>, vector<8x128xf32>
    tpu.vector_store %arg3[%c0_6, %c0_7], %18 {strides = array<i32>} : memref<8x128xf32, #tpu.memory_space<vmem>>, vector<8x128xf32>,
    return
  }
  func.func @transform_0(%arg0: i32, %arg1: i32) -> (i32, i32) {
    %c1_i32 = arith.constant 1 : i32
    %0 = arith.muli %arg0, %c1_i32 : i32
    %1 = arith.addi %0, %arg1 : i32
    %c0_i32 = arith.constant 0 : i32
    %2 = arith.minsi %1, %c0_i32 : i32
    %c0_i32_0 = arith.constant 0 : i32
    %c0_i32_1 = arith.constant 0 : i32
    return %2, %c0_i32_0 : i32, i32
  }
  func.func @transform_1(%arg0: i32, %arg1: i32) -> (i32, i32) {
    %c0_i32 = arith.constant 0 : i32
    %c0_i32_0 = arith.constant 0 : i32
    return %arg0, %c0_i32 : i32, i32
  }
}

</mosaic_0001>

<bundles_post_ra>
// kernel: tpu_custom_call.1
= control target key start
LH: loop header
LB: loop body
LE: loop exit
PB: predicated region body
PF: predicated region fallthrough
CT: control target
= control target key end

     0   :  { %6 = vsyncpa [#allocation3], 0  ;;  %s145_s0 = inlined_call_operand.hbm [shape: f32[8,128], index: 0, kind: input, shape index: {}]   ;;  %s146_s1 = inlined_call_operand.hbm [shape: f32[8,128], index: 1, kind: output, shape index: {}]  }
   0x1   :  { %7 = vsyncpa [#allocation4], 0  ;;  %s18_s8 = sshll.u32 %s145_s0, 4  ;;  %s127_s9 = smov [#allocation2]   ;;  %s19_s8 = int_to_ptr.hbm [resolvable:$true] %s18_s8 }
   0x2   :  { %s20_s10 = sshll.u32 %s127_s9, 4  ;;  %s21_s10 = int_to_ptr.vmem [resolvable:$true] %s20_s10 }
   0x3   :  { %23 = dma.hbm_to_vmem [thread:$0]  %s19_s8, 128, %s21_s10, [#allocation3]  }
   0x4   :  { %123 = dma.done.wait [#allocation3], 128  }
   0x5   :  { %124 = vsyncadd [#allocation3], 4294967168  ;;  %v37_v0 = vld [vmem:[#allocation2] sm:$0xff]  ;;  %s128_s11 = smov [#allocation5]   ;;  %s58_s15 = sshll.u32 %s146_s1, 4  ;;  %s59_s15 = int_to_ptr.hbm [resolvable:$true] %s58_s15 }
   0x6   :  { %73 = vlog2.f32 %v37_v0  ;;  %s56_s12 = sshll.u32 %s128_s11, 4  ;;  %s57_s12 = int_to_ptr.vmem [resolvable:$true] %s56_s12 }
   0xc   :  { %v74_v1 = vpop.eup %73 }
   0xd   :  { %v39_v2 = vmul.f32 0.6931472, %v74_v1 }
   0xf   :  { %50 = vst [vmem:[#allocation5] sm:$0xff] %v39_v2 }
  0x10   :  { %61 = dma.vmem_to_hbm [thread:$0]  %s57_s12, 128, %s59_s15, [#allocation4]  }
  0x11   :  { %125 = dma.done.wait [#allocation4], 128  }
  0x12   :  { %126 = vsyncadd [#allocation4], 4294967168 }
  0x13   :  { %66 = vsyncpa [#allocation3], 1 }
  0x14   :  { %67 = vsyncpa [#allocation4], 1 }

</bundles_post_ra>
